<compile_context>
chip_gen: v5e
topology: v5e:2x2
jax: 0.10.0
libtpu: 0.0.40
codegen_flags: <defaults>
</compile_context>

<pallas_src>
import functools
import math

import jax
import jax.numpy as jnp
from jax.experimental import pallas as pl
from jax.experimental.pallas import tpu as pltpu


def _round_up(v, m):
    return (v + m - 1) // m * m


def _pick_b_block(B, rows_per_sample, target_rows=2048):
    """Batch samples per grid step: big enough M for the MXU, but keep >= 2
    grid steps when B >= 2 (v7x has 2 TensorCores)."""
    bb = max(1, min(B, target_rows // max(1, rows_per_sample)))
    if B >= 2:
        bb = min(bb, max(1, B // 2))
    while B % bb:
        bb -= 1
    return bb


def _build_weights(wt, bt, w1, b1, *, Kt, c_in, c_out, act_func, mxu_dtype):
    """Fold the residual branch into the tconv weights and pad the output
    channels up to a multiple of 128 (lane-dense accumulator, free on MXU).

    Returns (wv, bv) for non-GLU, (wv, bv, wg, bg) for GLU.  Weights are in
    `mxu_dtype`, biases in f32 with shape (1, c_pad)."""
    wt = wt.astype(jnp.float32)
    bt = bt.astype(jnp.float32)

    wres = bres = None
    if act_func in ('GLU', 'relu'):          # only these use the residual
        if c_in > c_out:
            wres, bres = w1.astype(jnp.float32), b1.astype(jnp.float32)
        elif c_in < c_out:
            wres = jnp.concatenate(
                [jnp.eye(c_in, dtype=jnp.float32),
                 jnp.zeros((c_in, c_out - c_in), jnp.float32)], axis=1)
            bres = jnp.zeros((c_out,), jnp.float32)
        else:
            wres = jnp.eye(c_in, dtype=jnp.float32)
            bres = jnp.zeros((c_out,), jnp.float32)

    c_pad = _round_up(max(c_out, 128), 128)

    def pad_cols(w, b):
        w = jnp.pad(w, ((0, 0), (0, c_pad - c_out)))
        b = jnp.pad(b, ((0, c_pad - c_out),))
        return w.astype(mxu_dtype), b.reshape(1, c_pad).astype(jnp.float32)

    if act_func == 'GLU':
        wv, bv = wt[:, :c_out], bt[:c_out]
        wg, bg = wt[:, c_out:], bt[c_out:]
        wv = wv.at[(Kt - 1) * c_in:, :].add(wres)   # residual -> value path only
        bv = bv + bres
        return pad_cols(wv, bv) + pad_cols(wg, bg)

    wv, bv = wt, bt
    if wres is not None:                            # 'relu'
        wv = wv.at[(Kt - 1) * c_in:, :].add(wres)
        bv = bv + bres
    return pad_cols(wv, bv)


def _tcl_kernel(*refs, Kt, act_func, b_block):
    x_ref = refs[0]                 # (b_block, T, n, c_in)   mxu dtype
    wv_ref, bv_ref = refs[1], refs[2]
    out_ref = refs[-1]              # (b_block, c_out, T_out*n)  f32

    T, n, c_in = x_ref.shape[1], x_ref.shape[2], x_ref.shape[3]
    c_out = out_ref.shape[1]
    T_out = T - Kt + 1
    M0 = T_out * n

    # --- im2col: one (b_block*T_out*n, Kt*c_in) lhs so the MXU sees a single
    # long-K contraction instead of Kt short K=c_in pushes.  The T slices are
    # along the leading axis and the (T_out, n) merge keeps the lane layout.
    # The lane concat is done in 32-bit (most robust layout path); the lhs is
    # cast back to the MXU dtype right before the dot.
    slabs = []
    for b in range(b_block):
        xb = x_ref[b].astype(jnp.float32)                    # (T, n, c_in)
        win = jnp.concatenate([xb[k:k + T_out] for k in range(Kt)], axis=-1)
        slabs.append(win.reshape(M0, Kt * c_in))
    lhs = slabs[0] if b_block == 1 else jnp.concatenate(slabs, axis=0)
    lhs = lhs.astype(wv_ref.dtype)

    # --- temporal conv (+ folded residual + bias): one bf16 MXU matmul, f32 acc.
    val = jnp.dot(lhs, wv_ref[...], preferred_element_type=jnp.float32)
    val = val + bv_ref[...]

    if act_func == 'GLU':
        wg_ref, bg_ref = refs[3], refs[4]
        gate = jnp.dot(lhs, wg_ref[...], preferred_element_type=jnp.float32)
        gate = gate + bg_ref[...]
        act = val * jax.nn.sigmoid(gate)       # sigmoid runs on the EUP slot
    elif act_func == 'relu':
        act = jnp.maximum(val, 0.0)
    elif act_func == 'sigmoid':
        act = jax.nn.sigmoid(val)
    elif act_func == 'linear':
        act = val
    else:
        raise ValueError(f'activation "{act_func}" is not defined.')

    act = act.astype(out_ref.dtype)

    # --- NCHW-native, lane-dense store: per sample transpose the padded
    # (M0, c_pad) activation (exact (8,128) tiles -> cheap XLU transpose) and
    # keep the first c_out channel rows -> (c_out, T_out*n), lanes = T_out*n.
    for b in range(b_block):
        blk = act[b * M0:(b + 1) * M0, :]     # (M0, c_pad), sublane-aligned slice
        out_ref[b] = blk.T[:c_out, :]         # (c_out, M0)


def tcl_forward(x_nchw, wt, bt, w1, b1, *, Kt, c_in, c_out, act_func='relu',
                b_block=None, mxu_dtype=jnp.bfloat16):
    """Pallas TCL forward.  x_nchw: (B, c_in, T, n) -> (B, c_out, T-Kt+1, n)."""
    if act_func not in ('GLU', 'relu', 'sigmoid', 'linear'):
        raise ValueError(f'activation "{act_func}" is not defined.')
    B, C, T, n = x_nchw.shape
    assert C == c_in
    T_out = T - Kt + 1
    M0 = T_out * n

    # Channels-last + MXU dtype.  allow_input_fusion lets XLA fold this
    # transpose/convert into the pallas_call input pipeline rather than a
    # standalone HBM round trip.  (Keeping the surrounding model channels-last
    # would remove it entirely.)
    x = jnp.transpose(x_nchw, (0, 2, 3, 1)).astype(mxu_dtype)

    weights = _build_weights(wt, bt, w1, b1, Kt=Kt, c_in=c_in, c_out=c_out,
                             act_func=act_func, mxu_dtype=mxu_dtype)
    c_pad = weights[0].shape[1]

    if b_block is None:
        b_block = _pick_b_block(B, M0)
    grid = (B // b_block,)

    # Explicit VMEM budget with headroom (v7x has half the VMEM of v5e/v6e).
    vmem_est = (
        2 * b_block * T * _round_up(n, 16) * 128 * 2                     # x blocks (2x buffered)
        + 2 * b_block * _round_up(c_out, 8) * _round_up(M0, 128) * 4     # out blocks
        + sum(_round_up(w.shape[0], 16) * _round_up(w.shape[1], 128) * 4
              for w in weights)                                          # resident weights/biases
        + 8 * b_block * _round_up(M0, 8) * c_pad                         # in-kernel f32 temporaries
    )
    vmem_limit = int(min(max(4 * vmem_est, 16 * 2**20), 32 * 2**20))

    kernel = functools.partial(_tcl_kernel, Kt=Kt, act_func=act_func,
                               b_block=b_block)

    out = pl.pallas_call(
        kernel,
        out_shape=jax.ShapeDtypeStruct((B, c_out, M0), jnp.float32),
        grid_spec=pltpu.PrefetchScalarGridSpec(
            num_scalar_prefetch=0,
            grid=grid,
            in_specs=[pl.BlockSpec((b_block, T, n, c_in),
                                   lambda g: (g, 0, 0, 0))]
                     + [pl.BlockSpec(w.shape, lambda g: (0, 0))
                        for w in weights],
            out_specs=pl.BlockSpec((b_block, c_out, M0), lambda g: (g, 0, 0)),
        ),
        compiler_params=pltpu.CompilerParams(
            dimension_semantics=("parallel",),
            allow_input_fusion=[True] + [False] * len(weights),
            vmem_limit_bytes=vmem_limit,
        ),
    )(x, *weights)

    # Splitting T_out*n back into (T_out, n) is a free trailing-dim reshape.
    return out.reshape(B, c_out, T_out, n)


def tcl_ref(x_nchw, wt, bt, w1, b1, *, Kt, c_in, c_out, act_func='relu'):
    """Pure-JAX reference mirroring the PyTorch forward (for validation)."""
    B, _, T, n = x_nchw.shape
    c_out_t = 2 * c_out if act_func == 'GLU' else c_out
    w_oihw = wt.reshape(Kt, c_in, c_out_t).transpose(2, 1, 0)[..., None]
    tconv = jax.lax.conv_general_dilated(
        x_nchw, w_oihw, (1, 1), 'VALID',
        dimension_numbers=('NCHW', 'OIHW', 'NCHW')) + bt.reshape(1, -1, 1, 1)
    if c_in > c_out:
        w1_oihw = w1.T[:, :, None, None]
        x_input = jax.lax.conv_general_dilated(
            x_nchw, w1_oihw, (1, 1), 'VALID',
            dimension_numbers=('NCHW', 'OIHW', 'NCHW')) + b1.reshape(1, -1, 1, 1)
    elif c_in < c_out:
        x_input = jnp.concatenate(
            [x_nchw, jnp.zeros((B, c_out - c_in, T, n), x_nchw.dtype)], axis=1)
    else:
        x_input = x_nchw
    x_input = x_input[:, :, Kt - 1:T, :]
    if act_func == 'GLU':
        return (tconv[:, :c_out] + x_input) * jax.nn.sigmoid(tconv[:, -c_out:])
    elif act_func == 'relu':
        return jax.nn.relu(tconv + x_input)
    elif act_func == 'sigmoid':
        return jax.nn.sigmoid(tconv)
    return tconv


if __name__ == "__main__":
    B, c_in, T, n = 2, 4, 16, 16
    Kt, c_out = 3, 4
    T_out = T - Kt + 1

    key = jax.random.PRNGKey(0)
    kx, kw = jax.random.split(key)
    x = jax.random.normal(kx, (B, c_in, T, n), jnp.float32)
    # Reference consumes the same bf16-rounded operands the kernel feeds the MXU.
    x_r = x.astype(jnp.bfloat16).astype(jnp.float32)

    for act_func in ('relu', 'GLU'):
        c_out_t = 2 * c_out if act_func == 'GLU' else c_out
        k2, k3, k4, k5, kw = jax.random.split(kw, 5)
        bound_t = 1.0 / math.sqrt(c_in * Kt)
        wt = jax.random.uniform(k2, (Kt * c_in, c_out_t), jnp.float32,
                                -bound_t, bound_t)
        bt = jax.random.uniform(k3, (c_out_t,), jnp.float32, -bound_t, bound_t)
        bound_1 = 1.0 / math.sqrt(c_in)
        w1 = jax.random.uniform(k4, (c_in, c_out), jnp.float32, -bound_1, bound_1)
        b1 = jax.random.uniform(k5, (c_out,), jnp.float32, -bound_1, bound_1)

        fwd = jax.jit(functools.partial(
            tcl_forward, Kt=Kt, c_in=c_in, c_out=c_out, act_func=act_func))
        out = jax.block_until_ready(fwd(x, wt, bt, w1, b1))

        wt_r = wt.astype(jnp.bfloat16).astype(jnp.float32)
        w1_r = w1.astype(jnp.bfloat16).astype(jnp.float32)
        ref = tcl_ref(x_r, wt_r, bt, w1_r, b1,
                      Kt=Kt, c_in=c_in, c_out=c_out, act_func=act_func)

        assert out.shape == (B, c_out, T_out, n), (act_func, out.shape)
        err = float(jnp.max(jnp.abs(out - ref)))
        # bf16 weights + the residual fold bound the deviation well below 4e-2.
        assert err < 4e-2, (act_func, err)

    print("KERNEL_OK")
</pallas_src>

<mosaic_0001>
module attributes {stable_mosaic.version = 11 : i64} {
  func.func @_tcl_kernel(%arg0: i32, %arg1: memref<1x16x16x4xbf16, #tpu.memory_space<vmem>>, %arg2: memref<12x128xbf16, #tpu.memory_space<vmem>>, %arg3: memref<1x128xf32, #tpu.memory_space<vmem>>, %arg4: memref<1x4x224xf32, #tpu.memory_space<vmem>>) attributes {dimension_semantics = [#tpu.dimension_semantics<parallel>], iteration_bounds = array<i64: 2>, scalar_prefetch = 0 : i64, scratch_operands = 0 : i64, tpu.core_type = #tpu.core_type<tc>, window_params = [{transform_indices = @transform_0, window_bounds = array<i64: 1, 16, 16, 4>}, {pipeline_mode = #tpu.pipeline_mode<synchronous>, transform_indices = @transform_1, window_bounds = array<i64: 12, 128>}, {pipeline_mode = #tpu.pipeline_mode<synchronous>, transform_indices = @transform_2, window_bounds = array<i64: 1, 128>}, {transform_indices = @transform_3, window_bounds = array<i64: 1, 4, 224>}]} {
    %c0 = arith.constant 0 : index
    %c0_0 = arith.constant 0 : index
    %c0_1 = arith.constant 0 : index
    %c0_2 = arith.constant 0 : index
    %0 = vector.load %arg1[%c0, %c0_0, %c0_1, %c0_2] : memref<1x16x16x4xbf16, #tpu.memory_space<vmem>>, vector<1x16x16x4xbf16>
    %1 = vector.shape_cast %0 : vector<1x16x16x4xbf16> to vector<16x16x4xbf16>
    %2 = arith.extf %1 : vector<16x16x4xbf16> to vector<16x16x4xf32>
    %3 = vector.extract_strided_slice %2 {offsets = [0, 0, 0], sizes = [14, 16, 4], strides = [1, 1, 1]} : vector<16x16x4xf32> to vector<14x16x4xf32>
    %4 = vector.extract_strided_slice %2 {offsets = [1, 0, 0], sizes = [14, 16, 4], strides = [1, 1, 1]} : vector<16x16x4xf32> to vector<14x16x4xf32>
    %5 = vector.extract_strided_slice %2 {offsets = [2, 0, 0], sizes = [14, 16, 4], strides = [1, 1, 1]} : vector<16x16x4xf32> to vector<14x16x4xf32>
    %6 = tpu.concatenate %3, %4, %5 in 2 : vector<14x16x4xf32>, vector<14x16x4xf32>, vector<14x16x4xf32> -> vector<14x16x12xf32>
    %7 = vector.shape_cast %6 : vector<14x16x12xf32> to vector<224x12xf32>
    %8 = arith.truncf %7 : vector<224x12xf32> to vector<224x12xbf16>
    %c0_3 = arith.constant 0 : index
    %c0_4 = arith.constant 0 : index
    %9 = vector.load %arg2[%c0_3, %c0_4] : memref<12x128xbf16, #tpu.memory_space<vmem>>, vector<12x128xbf16>
    %cst = arith.constant dense<0.000000e+00> : vector<224x128xf32>
    %10 = tpu.matmul %8, %9, %cst {dimension_numbers = #tpu.dot_dimension_numbers<[1], [0], [0], [1], [0, 0, 1, 1], [], []>} : vector<224x12xbf16>, vector<12x128xbf16>, vector<224x128xf32> -> vector<224x128xf32>
    %c0_5 = arith.constant 0 : index
    %c0_6 = arith.constant 0 : index
    %11 = vector.load %arg3[%c0_5, %c0_6] : memref<1x128xf32, #tpu.memory_space<vmem>>, vector<1x128xf32>
    %12 = vector.broadcast %11 : vector<1x128xf32> to vector<224x128xf32>
    %13 = arith.addf %10, %12 : vector<224x128xf32>
    %cst_7 = arith.constant 0.000000e+00 : f32
    %14 = vector.broadcast %cst_7 : f32 to vector<224x128xf32>
    %15 = arith.maximumf %13, %14 : vector<224x128xf32>
    %16 = tpu.transpose %15, [1, 0] : vector<224x128xf32> -> vector<128x224xf32>
    %17 = vector.extract_strided_slice %16 {offsets = [0, 0], sizes = [4, 224], strides = [1, 1]} : vector<128x224xf32> to vector<4x224xf32>
    %c0_8 = arith.constant 0 : index
    %c0_9 = arith.constant 0 : index
    %c0_10 = arith.constant 0 : index
    %18 = vector.load %arg4[%c0_8, %c0_9, %c0_10] : memref<1x4x224xf32, #tpu.memory_space<vmem>>, vector<1x4x224xf32>
    %19 = vector.shape_cast %18 : vector<1x4x224xf32> to vector<4x224xf32>
    %20 = vector.shape_cast %17 : vector<4x224xf32> to vector<1x4x224xf32>
    tpu.vector_store %arg4[%c0_8, %c0_9, %c0_10], %20 {strides = array<i32>} : memref<1x4x224xf32, #tpu.memory_space<vmem>>, vector<1x4x224xf32>,
    return
  }
  func.func @transform_0(%arg0: i32) -> (i32, i32, i32, i32) {
    %c0_i32 = arith.constant 0 : i32
    %c0_i32_0 = arith.constant 0 : i32
    %c0_i32_1 = arith.constant 0 : i32
    %c0_i32_2 = arith.constant 0 : i32
    return %arg0, %c0_i32, %c0_i32_0, %c0_i32_1 : i32, i32, i32, i32
  }
  func.func @transform_1(%arg0: i32) -> (i32, i32) {
    %c0_i32 = arith.constant 0 : i32
    %c0_i32_0 = arith.constant 0 : i32
    %c0_i32_1 = arith.constant 0 : i32
    return %c0_i32, %c0_i32_0 : i32, i32
  }
  func.func @transform_2(%arg0: i32) -> (i32, i32) {
    %c0_i32 = arith.constant 0 : i32
    %c0_i32_0 = arith.constant 0 : i32
    %c0_i32_1 = arith.constant 0 : i32
    return %c0_i32, %c0_i32_0 : i32, i32
  }
  func.func @transform_3(%arg0: i32) -> (i32, i32, i32) {
    %c0_i32 = arith.constant 0 : i32
    %c0_i32_0 = arith.constant 0 : i32
    %c0_i32_1 = arith.constant 0 : i32
    return %arg0, %c0_i32, %c0_i32_0 : i32, i32, i32
  }
}

</mosaic_0001>

<bundles_post_ra>
// kernel: tcl_forward.2
= control target key start
LH: loop header
LB: loop body
LE: loop exit
PB: predicated region body
PF: predicated region fallthrough
CT: control target
= control target key end

     0   :  { %s1562_s12 = smov 0   ;;  %s1886_s0 = inlined_call_operand.vmem [shape: bf16[12,128], index: 0, kind: input, shape index: {}]   ;;  %s1887_s1 = inlined_call_operand.vmem [shape: f32[1,128], index: 1, kind: input, shape index: {}]   ;;  %s1888_s2 = inlined_call_operand.vmem [shape: bf16[2,4,16,16], index: 2, kind: input, shape index: {}]   ;;  %s1889_s3 = inlined_call_operand.vmem [shape: f32[2,4,224], index: 3, kind: output, shape index: {}]  }
   0x1 LB: > { %s1085_s13 = sadd.s32 4294967295, %s1538_s12   ;;  %p1089_p0 = scmp.ge.s32.totalorder %s1538_s12, 1  ;;  %s1538_s12 = sphi %s1562_s12, %s13_s12  }
   0x2   : > { %p137_p1 = scmp.lt.s32.totalorder %s1538_s12, 3 }
   0x4   : > { %p138_p2 = pnand %p1089_p0, %p137_p1 }
   0x6   : > { %141 = sbr.rel (%p138_p2) target bundleno = 447 (0x1bf), region = 32 }
   0xb   : > { %p161_p3 = scmp.lt.s32.totalorder %s1085_s13, 1  ;;  %s1540_s18 = smov 4   ;;  %v1127_v61 = vld [vmem:[%s1886_s0] sm:$0xf]  ;;  %v1147_v62 = vld [vmem:[%s1886_s0] sm:$0x30] }
   0xc   : > { %s1541_s19 = smov 8   ;;  %v1128_v63 = vor.u32 %v1147_v62, %v1127_v61  ;;  %vm846_vm0 = vcmask 1045504   ;;  %vm720_vm1 = vcmask 31744   ;;  %vm749_vm2 = vcmask 64512  }
   0xd   : > { %s1891_s13 = smov (!%p161_p3, %s1085_s13), 1  ;;  %vm803_vm3 = vcmask 97280   ;;  %vm1024_vm4 = vcmask 1043456   ;;  %vm1027_vm5 = vcmask 785412  }
   0xe   : > { %s1145_s14 = sshll.u32 %s1891_s13, 7  ;;  %s1146_s26 = sshll.u32 %s1891_s13, 3  ;;  %vm1028_vm6 = vmor %vm1027_vm5, %vm1024_vm4 }
   0xf   : > { %s1576_s17 = scalar_lea.vmem %s1888_s2, %s1145_s14  ;;  %s170_s29 = scalar_lea.vmem %s1889_s3, %s1146_s26 }
  0x10   : > { %v1579_v0 = vld [vmem:[%s1576_s17 + $0x48] sm:$0xff]  ;;  %v1585_v2 = vld [vmem:[%s1576_s17 + $0x10] sm:$0xff]  ;;  %v1607_v12 = vld [vmem:[%s1576_s17 + $0x58] sm:$0xff] }
  0x11   : > { %v1582_v1 = vld [vmem:[%s1576_s17 + $0x8] sm:$0xff]  ;;  %v1261_v3 = vunpack.c.l.bf16 %v1579_v0  ;;  %v1262_v4 = vunpack.c.h.bf16 %v1579_v0  ;;  %v1592_v7 = vld [vmem:[%s1576_s17 + $0x50] sm:$0xff]  ;;  %v1233_v8 = vunpack.c.l.bf16 %v1585_v2  ;;  %v1234_v9 = vunpack.c.h.bf16 %v1585_v2  ;;  %v1614_v14 = vld [vmem:[%s1576_s17 + $0x18] sm:$0xff] }
  0x12   : > { %v1229_v5 = vunpack.c.l.bf16 %v1582_v1  ;;  %v1230_v6 = vunpack.c.h.bf16 %v1582_v1  ;;  %v1265_v15 = vunpack.c.l.bf16 %v1592_v7  ;;  %v1266_v16 = vunpack.c.h.bf16 %v1592_v7  ;;  %v1622_v17 = vld [vmem:[%s1576_s17 + $0x30] sm:$0xff]  ;;  %v1626_v18 = vld [vmem:[%s1576_s17 + $0x60] sm:$0xff]  ;;  %v1634_v22 = vld [vmem:[%s1576_s17 + $0x38] sm:$0xff] }
  0x13   : > { %v1600_v10 = vpack.i.bf16 %v1262_v4, %v1261_v3  ;;  %v1396_v13 = vpack.i.bf16 %v1234_v9, %v1233_v8  ;;  %v1629_v19 = vld [vmem:[%s1576_s17 + $0x20] sm:$0xff]  ;;  %v1237_v20 = vunpack.c.l.bf16 %v1614_v14  ;;  %v1238_v21 = vunpack.c.h.bf16 %v1614_v14  ;;  %v1649_v27 = vld [vmem:[%s1576_s17 + $0x28] sm:$0xff]  ;;  %v1375_v28 = vld [vmem:[%s1576_s17 + $0x70] sm:$0xff] }
  0x14   : > { %v1391_v11 = vpack.i.bf16 %v1230_v6, %v1229_v5  ;;  %v1406_v23 = vpack.i.bf16 %v1266_v16, %v1265_v15  ;;  %v1269_v25 = vunpack.c.l.bf16 %v1607_v12  ;;  %v1270_v26 = vunpack.c.h.bf16 %v1607_v12  ;;  %v1668_v35 = vld [vmem:[%s1576_s17 + $0x68] sm:$0xff]  ;;  %v1376_v45 = vld [vmem:[%s1576_s17 + $0x78] sm:$0xff]  ;;  %v1369_v46 = vld [vmem:[%s1576_s17 + $0x40] sm:$0xff] }
  0x15   : > { %1402 = vrot.lane.b32.xlu1 %v1600_v10, %s1540_s18  ;;  %1412 = vrot.lane.b32.xlu2 %v1396_v13, %s1540_s18  ;;  %v1441_v24 = vpack.i.bf16 %v1238_v21, %v1237_v20  ;;  %v1245_v29 = vunpack.c.l.bf16 %v1649_v27  ;;  %v1246_v30 = vunpack.c.h.bf16 %v1649_v27  ;;  %v1249_v33 = vunpack.c.l.bf16 %v1622_v17  ;;  %v171_v60 = vld [vmem:[%s1576_s17] sm:$0xff]  }
  0x16   : > { %1392 = vrot.lane.b32.xlu0 %v1391_v11, %s1540_s18  ;;  %v1426_v31 = vpack.i.bf16 %v1270_v26, %v1269_v25  ;;  %v1250_v34 = vunpack.c.h.bf16 %v1622_v17  ;;  %v1241_v36 = vunpack.c.l.bf16 %v1629_v19  ;;  %v1242_v37 = vunpack.c.h.bf16 %v1629_v19  ;;  %177 = vst [vmem:[#allocation2] sm:$0xff] %v171_v60  }
  0x17   : > { %v1431_v32 = vpack.i.bf16 %v1246_v30, %v1245_v29  ;;  %v1273_v40 = vunpack.c.l.bf16 %v1626_v18  ;;  %v1274_v41 = vunpack.c.h.bf16 %v1626_v18  ;;  %v1253_v43 = vunpack.c.l.bf16 %v1634_v22 }
  0x18   : > { %v1436_v38 = vpack.i.bf16 %v1250_v34, %v1249_v33  ;;  %v1471_v39 = vpack.i.bf16 %v1242_v37, %v1241_v36  ;;  %v1254_v44 = vunpack.c.h.bf16 %v1634_v22  ;;  %v1277_v47 = vunpack.c.l.bf16 %v1668_v35 }
  0x19   : > { %v1456_v42 = vpack.i.bf16 %v1274_v41, %v1273_v40  ;;  %v1278_v48 = vunpack.c.h.bf16 %v1668_v35  ;;  %v1281_v51 = vunpack.c.l.bf16 %v1375_v28  ;;  %v1282_v52 = vunpack.c.h.bf16 %v1375_v28 }
  0x1a   : > { %v1466_v49 = vpack.i.bf16 %v1254_v44, %v1253_v43  ;;  %v1257_v54 = vunpack.c.l.bf16 %v1369_v46  ;;  %v1258_v55 = vunpack.c.h.bf16 %v1369_v46  ;;  %v1285_v57 = vunpack.c.l.bf16 %v1376_v45 }
  0x1b   : > { %v1496_v50 = vpack.i.bf16 %v1278_v48, %v1277_v47  ;;  %v1486_v53 = vpack.i.bf16 %v1282_v52, %v1281_v51  ;;  %v1286_v58 = vunpack.c.h.bf16 %v1376_v45  ;;  %v848_v11 = vsel %vm846_vm0, %v1128_v63, 0 }
  0x1c   : > { %v1506_v56 = vpack.i.bf16 %v1258_v55, %v1257_v54  ;;  %857 = vmatpush.bf16.msra.mxu0 %v848_v11  ;;  %1378 = vmatpush.bf16.msra.mxu2 %v848_v11 }
  0x1d   : > { %1407 = vrot.lane.b32.xlu1 %v1406_v23, %s1541_s19  ;;  %1417 = vrot.lane.b32.xlu2 %v1441_v24, %s1541_s19  ;;  %v1516_v59 = vpack.i.bf16 %v1286_v58, %v1285_v57  ;;  %v1224_v28 = vld [vmem:[#allocation2] sm:$0xff]  }
  0x1e   : > { %1397 = vrot.lane.b32.xlu0 %v1396_v13, %s1541_s19  ;;  %1377 = vmatpush.bf16.msra.mxu1 %v848_v11 }
  0x1f   : > { %1379 = vmatpush.bf16.msra.mxu3 %v848_v11 }
  0x25   : > { %1427 = vrot.lane.b32.xlu1 %v1426_v31, %s1541_s19  ;;  %1432 = vrot.lane.b32.xlu2 %v1431_v32, %s1540_s18 }
  0x26   : > { %1422 = vrot.lane.b32.xlu0 %v1406_v23, %s1540_s18 }
  0x2d   : > { %1442 = vrot.lane.b32.xlu1 %v1441_v24, %s1540_s18  ;;  %1447 = vrot.lane.b32.xlu2 %v1471_v39, %s1541_s19 }
  0x2e   : > { %1437 = vrot.lane.b32.xlu0 %v1436_v38, %s1541_s19 }
  0x35   : > { %1457 = vrot.lane.b32.xlu1 %v1456_v42, %s1541_s19  ;;  %1462 = vrot.lane.b32.xlu2 %v1436_v38, %s1540_s18 }
  0x36   : > { %1452 = vrot.lane.b32.xlu0 %v1426_v31, %s1540_s18  ;;  %v1225_v31 = vunpack.c.l.bf16 %v1224_v28 }
  0x3d   : > { %1472 = vrot.lane.b32.xlu1 %v1471_v39, %s1540_s18  ;;  %1477 = vrot.lane.b32.xlu2 %v1496_v50, %s1540_s18 }
  0x3e   : > { %1467 = vrot.lane.b32.xlu0 %v1466_v49, %s1541_s19 }
  0x45   : > { %1487 = vrot.lane.b32.xlu1 %v1486_v53, %s1541_s19  ;;  %1492 = vrot.lane.b32.xlu2 %v1456_v42, %s1540_s18 }
  0x46   : > { %1482 = vrot.lane.b32.xlu0 %v1431_v32, %s1541_s19  ;;  %v1226_v32 = vunpack.c.h.bf16 %v1224_v28 }
  0x4d   : > { %1502 = vrot.lane.b32.xlu1 %v1466_v49, %s1540_s18  ;;  %1507 = vrot.lane.b32.xlu2 %v1506_v56, %s1541_s19 }
  0x4e   : > { %1497 = vrot.lane.b32.xlu0 %v1496_v50, %s1541_s19 }
  0x55   : > { %1517 = vrot.lane.b32.xlu1 %v1516_v59, %s1541_s19  ;;  %1522 = vrot.lane.b32.xlu2 %v1506_v56, %s1540_s18 }
  0x56   : > { %1512 = vrot.lane.b32.xlu0 %v1486_v53, %s1540_s18 }
  0x5e   : > { %1527 = vrot.lane.b32.xlu0 %v1600_v10, %s1541_s19 }
  0x6f   : > { %v1413_v13 = vpop.permute.xlu2 %1412 }
  0x77   : > { %v1418_v23 = vpop.permute.xlu2 %1417 }
  0x7f   : > { %v1433_v38 = vpop.permute.xlu2 %1432 }
  0x87   : > { %v1403_v10 = vpop.permute.xlu1 %1402 }
  0x88   : > { %v1393_v24 = vpop.permute.xlu0 %1392  ;;  %v1405_v39 = vunpack.i.h.bf16 %v1403_v10  ;;  %v1404_v42 = vunpack.i.l.bf16 %v1403_v10 }
  0x89   : > { %v1395_v45 = vunpack.i.h.bf16 %v1393_v24  ;;  %v1394_v46 = vunpack.i.l.bf16 %v1393_v24 }
  0x8a   : > { %v737_v57 = vsel %vm720_vm1, %v1257_v54, %v1404_v42  ;;  %v738_v58 = vsel %vm720_vm1, %v1258_v55, %v1405_v39  ;;  %v1448_v54 = vpop.permute.xlu2 %1447  ;;  %v1414_v39 = vunpack.i.l.bf16 %v1413_v13 }
  0x8b   : > { %v721_v59 = vsel %vm720_vm1, %v1225_v31, %v1394_v46  ;;  %v722_v60 = vsel %vm720_vm1, %v1226_v32, %v1395_v45  ;;  %v1415_v31 = vunpack.i.h.bf16 %v1413_v13  ;;  %v1435_v45 = vunpack.i.h.bf16 %v1433_v38 }
  0x8c   : > { %v1434_v46 = vunpack.i.l.bf16 %v1433_v38 }
  0x8e   : > { %v729_v1 = vsel %vm720_vm1, %v1241_v36, %v1434_v46 }
  0x8f   : > { %v1408_v49 = vpop.permute.xlu1 %1407 }
  0x90   : > { %v1398_v50 = vpop.permute.xlu0 %1397  ;;  %v1410_v51 = vunpack.i.h.bf16 %v1408_v49  ;;  %v1409_v52 = vunpack.i.l.bf16 %v1408_v49  ;;  %v1420_v49 = vunpack.i.h.bf16 %v1418_v23 }
  0x91   : > { %v1400_v53 = vunpack.i.h.bf16 %v1398_v50  ;;  %v1399_v56 = vunpack.i.l.bf16 %v1398_v50  ;;  %v1419_v50 = vunpack.i.l.bf16 %v1418_v23  ;;  %v730_v23 = vsel %vm720_vm1, %v1242_v37, %v1435_v45 }
  0x92   : > { %v766_v63 = vsel %vm749_vm2, %v737_v57, %v1409_v52  ;;  %v767_v11 = vsel %vm749_vm2, %v738_v58, %v1410_v51  ;;  %v723_v51 = vsel %vm720_vm1, %v1229_v5, %v1414_v39  ;;  %v724_v52 = vsel %vm720_vm1, %v1230_v6, %v1415_v31 }
  0x93   : > { %v750_v61 = vsel %vm749_vm2, %v721_v59, %v1399_v56  ;;  %v751_v62 = vsel %vm749_vm2, %v722_v60, %v1400_v53  ;;  %v786_v24 = vpack.c.bf16 %v767_v11, %v766_v63  ;;  %v752_v59 = vsel %vm749_vm2, %v723_v51, %v1419_v50  ;;  %v1463_v60 = vpop.permute.xlu2 %1462 }
  0x94   : > { %v778_v10 = vpack.c.bf16 %v751_v62, %v750_v61  ;;  %v1465_v39 = vunpack.i.h.bf16 %v1463_v60  ;;  %v1449_v45 = vunpack.i.l.bf16 %v1448_v54 }
  0x95   : > { %1137 = vmatmul.msk.bf16.vlgmr.msra.gmra.mxu2 %vm803_vm3, %v786_v24 }
  0x96   : > { %1129 = vmatmul.msk.bf16.vlgmr.msra.gmra.mxu0 %vm803_vm3, %v778_v10 }
  0x97   : > { %v1428_v55 = vpop.permute.xlu1 %1427 }
  0x98   : > { %v1423_v28 = vpop.permute.xlu0 %1422  ;;  %v1430_v53 = vunpack.i.h.bf16 %v1428_v55  ;;  %v1429_v56 = vunpack.i.l.bf16 %v1428_v55 }
  0x99   : > { %v1425_v32 = vunpack.i.h.bf16 %v1423_v28  ;;  %v1424_v42 = vunpack.i.l.bf16 %v1423_v28 }
  0x9b   : > { %v740_v13 = vsel %vm720_vm1, %v1262_v4, %v1425_v32  ;;  %v739_v38 = vsel %vm720_vm1, %v1261_v3, %v1424_v42  ;;  %v753_v4 = vsel %vm749_vm2, %v724_v52, %v1420_v49  ;;  %v1478_v31 = vpop.permute.xlu2 %1477  ;;  %v1464_v32 = vunpack.i.l.bf16 %v1463_v60 }
  0x9c   : > { %v768_v0 = vsel %vm749_vm2, %v739_v38, %v1429_v56  ;;  %v769_v3 = vsel %vm749_vm2, %v740_v13, %v1430_v53  ;;  %v779_v19 = vpack.c.bf16 %v753_v4, %v752_v59  ;;  %v1450_v42 = vunpack.i.h.bf16 %v1448_v54 }
  0x9d   : > { %v787_v36 = vpack.c.bf16 %v769_v3, %v768_v0  ;;  %v732_v54 = vsel %vm720_vm1, %v1246_v30, %v1465_v39  ;;  %v731_v2 = vsel %vm720_vm1, %v1245_v29, %v1464_v32  ;;  %v1479_v29 = vunpack.i.l.bf16 %v1478_v31 }
  0x9f   : > { %v1443_v5 = vpop.permute.xlu1 %1442  ;;  %v745_v59 = vsel %vm720_vm1, %v1273_v40, %v1479_v29 }
  0xa0   : > { %v1438_v6 = vpop.permute.xlu0 %1437  ;;  %v1445_v10 = vunpack.i.h.bf16 %v1443_v5  ;;  %v1444_v24 = vunpack.i.l.bf16 %v1443_v5  ;;  %v1480_v5 = vunpack.i.h.bf16 %v1478_v31 }
  0xa1   : > { %v1440_v57 = vunpack.i.h.bf16 %v1438_v6  ;;  %v1439_v58 = vunpack.i.l.bf16 %v1438_v6 }
  0xa2   : > { %v725_v46 = vsel %vm720_vm1, %v1233_v8, %v1444_v24  ;;  %v726_v49 = vsel %vm720_vm1, %v1234_v9, %v1445_v10 }
  0xa3   : > { %v758_v61 = vsel %vm749_vm2, %v729_v1, %v1439_v58  ;;  %v759_v37 = vsel %vm749_vm2, %v730_v23, %v1440_v57  ;;  %v754_v38 = vsel %vm749_vm2, %v725_v46, %v1449_v45  ;;  %v1493_v57 = vpop.permute.xlu2 %1492  ;;  %v746_v58 = vsel %vm720_vm1, %v1274_v41, %v1480_v5 }
  0xa4   : > { %v782_v62 = vpack.c.bf16 %v759_v37, %v758_v61 }
  0xa5   : > { %1138 = vmatmul.msk.bf16.gmra.mxu2 %vm803_vm3, %v787_v36  ;;  %v1495_v36 = vunpack.i.h.bf16 %v1493_v57 }
  0xa6   : > { %1130 = vmatmul.msk.bf16.gmra.mxu0 %vm803_vm3, %v779_v19  ;;  %1133 = vmatmul.msk.bf16.vlgmr.msra.gmra.mxu1 %vm803_vm3, %v782_v62 }
  0xa7   : > { %v1458_v63 = vpop.permute.xlu1 %1457 }
  0xa8   : > { %v1453_v11 = vpop.permute.xlu0 %1452  ;;  %v1460_v50 = vunpack.i.h.bf16 %v1458_v63  ;;  %v1459_v51 = vunpack.i.l.bf16 %v1458_v63  ;;  %v1494_v63 = vunpack.i.l.bf16 %v1493_v57 }
  0xa9   : > { %v1455_v55 = vunpack.i.h.bf16 %v1453_v11  ;;  %v1454_v28 = vunpack.i.l.bf16 %v1453_v11 }
  0xab   : > { %v742_v52 = vsel %vm720_vm1, %v1266_v16, %v1455_v55  ;;  %v741_v53 = vsel %vm720_vm1, %v1265_v15, %v1454_v28  ;;  %v755_v16 = vsel %vm749_vm2, %v726_v49, %v1450_v42  ;;  %v1508_v41 = vpop.permute.xlu2 %1507  ;;  %v744_v55 = vsel %vm720_vm1, %v1270_v26, %v1495_v36 }
  0xac   : > { %v770_v7 = vsel %vm749_vm2, %v741_v53, %v1459_v51  ;;  %v771_v15 = vsel %vm749_vm2, %v742_v52, %v1460_v50  ;;  %v780_v1 = vpack.c.bf16 %v755_v16, %v754_v38  ;;  %v743_v28 = vsel %vm720_vm1, %v1269_v25, %v1494_v63 }
  0xad   : > { %v788_v6 = vpack.c.bf16 %v771_v15, %v770_v7  ;;  %v1510_v14 = vunpack.i.h.bf16 %v1508_v41  ;;  %v1509_v42 = vunpack.i.l.bf16 %v1508_v41 }
  0xaf   : > { %v1473_v8 = vpop.permute.xlu1 %1472 }
  0xb0   : > { %v1468_v9 = vpop.permute.xlu0 %1467  ;;  %v1475_v0 = vunpack.i.h.bf16 %v1473_v8  ;;  %v1474_v3 = vunpack.i.l.bf16 %v1473_v8 }
  0xb1   : > { %v1470_v56 = vunpack.i.h.bf16 %v1468_v9  ;;  %v1469_v13 = vunpack.i.l.bf16 %v1468_v9 }
  0xb2   : > { %v728_v18 = vsel %vm720_vm1, %v1238_v21, %v1475_v0  ;;  %v727_v40 = vsel %vm720_vm1, %v1237_v20, %v1474_v3 }
  0xb3   : > { %v760_v23 = vsel %vm749_vm2, %v731_v2, %v1469_v13  ;;  %v761_v30 = vsel %vm749_vm2, %v732_v54, %v1470_v56 }
  0xb4   : > { %v783_v27 = vpack.c.bf16 %v761_v30, %v760_v23 }
  0xb5   : > { %1139 = vmatmul.msk.bf16.gmra.mxu2 %vm803_vm3, %v788_v6 }
  0xb6   : > { %1131 = vmatmul.msk.bf16.gmra.mxu0 %vm803_vm3, %v780_v1  ;;  %1134 = vmatmul.msk.bf16.gmra.mxu1 %vm803_vm3, %v783_v27 }
  0xb7   : > { %v1488_v4 = vpop.permute.xlu1 %1487 }
  0xb8   : > { %v1483_v60 = vpop.permute.xlu0 %1482  ;;  %v1490_v61 = vunpack.i.h.bf16 %v1488_v4  ;;  %v1489_v37 = vunpack.i.l.bf16 %v1488_v4 }
  0xb9   : > { %v1485_v11 = vunpack.i.h.bf16 %v1483_v60  ;;  %v1484_v10 = vunpack.i.l.bf16 %v1483_v60 }
  0xba   : > { %v774_v19 = vsel %vm749_vm2, %v745_v59, %v1489_v37  ;;  %v775_v62 = vsel %vm749_vm2, %v746_v58, %v1490_v61  ;;  %v1849_v58 = vld [vmem:[%s1887_s1] ss:$0 sm:$0xff] }
  0xbb   : > { %v790_v24 = vpack.c.bf16 %v775_v62, %v774_v19  ;;  %v756_v39 = vsel %vm749_vm2, %v727_v40, %v1484_v10  ;;  %v757_v21 = vsel %vm749_vm2, %v728_v18, %v1485_v11 }
  0xbc   : > { %v781_v51 = vpack.c.bf16 %v757_v21, %v756_v39 }
  0xbd   : > { %1141 = vmatmul.msk.bf16.vlgmr.msra.gmra.mxu3 %vm803_vm3, %v790_v24 }
  0xbf   : > { %v1503_v32 = vpop.permute.xlu1 %1502 }
  0xc0   : > { %v1498_v31 = vpop.permute.xlu0 %1497  ;;  %v1505_v46 = vunpack.i.h.bf16 %v1503_v32  ;;  %v1504_v49 = vunpack.i.l.bf16 %v1503_v32 }
  0xc1   : > { %v1500_v20 = vunpack.i.h.bf16 %v1498_v31  ;;  %v1499_v45 = vunpack.i.l.bf16 %v1498_v31 }
  0xc2   : > { %v734_v12 = vsel %vm720_vm1, %v1250_v34, %v1505_v46  ;;  %v733_v25 = vsel %vm720_vm1, %v1249_v33, %v1504_v49  ;;  %v1523_v33 = vpop.permute.xlu2 %1522 }
  0xc3   : > { %v772_v50 = vsel %vm749_vm2, %v743_v28, %v1499_v45  ;;  %v773_v26 = vsel %vm749_vm2, %v744_v55, %v1500_v20  ;;  %v762_v53 = vsel %vm749_vm2, %v733_v25, %v1509_v42  ;;  %v763_v54 = vsel %vm749_vm2, %v734_v12, %v1510_v14 }
  0xc4   : > { %v789_v52 = vpack.c.bf16 %v773_v26, %v772_v50  ;;  %v784_v2 = vpack.c.bf16 %v763_v54, %v762_v53  ;;  %v1525_v23 = vunpack.i.h.bf16 %v1523_v33  ;;  %v1524_v30 = vunpack.i.l.bf16 %v1523_v33 }
  0xc6   : > { %1132 = vmatmul.msk.bf16.gmra.mxu0 %vm803_vm3, %v781_v51  ;;  %1140 = vmatmul.msk.bf16.gmra.mxu2 %vm803_vm3, %v789_v52  ;;  %v736_v27 = vsel %vm720_vm1, %v1254_v44, %v1525_v23 }
  0xc7   : > { %1135 = vmatmul.msk.bf16.gmra.mxu1 %vm803_vm3, %v784_v2  ;;  %v1518_v9 = vpop.permute.xlu1 %1517 }
  0xc8   : > { %v1513_v8 = vpop.permute.xlu0 %1512  ;;  %v1520_v17 = vunpack.i.h.bf16 %v1518_v9  ;;  %v1519_v13 = vunpack.i.l.bf16 %v1518_v9 }
  0xc9   : > { %v1515_v34 = vunpack.i.h.bf16 %v1513_v8  ;;  %v1514_v56 = vunpack.i.l.bf16 %v1513_v8 }
  0xcb   : > { %v748_v38 = vsel %vm720_vm1, %v1278_v48, %v1515_v34  ;;  %v747_v16 = vsel %vm720_vm1, %v1277_v47, %v1514_v56  ;;  %v735_v48 = vsel %vm720_vm1, %v1253_v43, %v1524_v30 }
  0xcc   : > { %v776_v7 = vsel %vm749_vm2, %v747_v16, %v1519_v13  ;;  %v777_v15 = vsel %vm749_vm2, %v748_v38, %v1520_v17 }
  0xcd   : > { %v791_v1 = vpack.c.bf16 %v777_v15, %v776_v7 }
  0xcf   : > { %1142 = vmatmul.msk.bf16.gmra.mxu3 %vm803_vm3, %v791_v1 }
  0xd0   : > { %v1528_v35 = vpop.permute.xlu0 %1527 }
  0xd1   : > { %v1530_v5 = vunpack.i.h.bf16 %v1528_v35  ;;  %v1529_v47 = vunpack.i.l.bf16 %v1528_v35 }
  0xd3   : > { %v764_v29 = vsel %vm749_vm2, %v735_v48, %v1529_v47  ;;  %v765_v6 = vsel %vm749_vm2, %v736_v27, %v1530_v5 }
  0xd4   : > { %v785_v57 = vpack.c.bf16 %v765_v6, %v764_v29 }
  0xd7   : > { %1136 = vmatmul.msk.bf16.gmra.mxu1 %vm803_vm3, %v785_v57 }
 0x113   : > { %v859_v44 = vpop.f32.mrf.mxu0 }
 0x114   : > { %v860_v22 = vadd.f32 %v1849_v58, %v859_v44 }
 0x116   : > { %v929_v59 = vmax.f32 %v860_v22, 0.0 }
 0x118   : > { %957 = vxpose.xlu1.b32.start [1/16] (narrow) %v929_v59, 8  ;;  %v899_v43 = vpop.f32.mrf.mxu2 }
 0x119   : > { %v900_v4 = vadd.f32 %v1849_v58, %v899_v43 }
 0x11b   : > { %v861_v60 = vpop.f32.mrf.mxu0  ;;  %v945_v0 = vmax.f32 %v900_v4, 0.0 }
 0x11c   : > { %v862_v3 = vadd.f32 %v1849_v58, %v861_v60 }
 0x11d   : > { %989 = vxpose.xlu2.b32.start [1/12] (short) (narrow) %v945_v0, 8 }
 0x11e   : > { %v930_v61 = vmax.f32 %v862_v3, 0.0 }
 0x120   : > { %958 = vxpose.xlu1.b32.cont [2/16] (narrow) %v930_v61, 8  ;;  %v901_v37 = vpop.f32.mrf.mxu2 }
 0x121   : > { %v902_v19 = vadd.f32 %v1849_v58, %v901_v37 }
 0x123   : > { %v864_v62 = vpop.f32.mrf.mxu0  ;;  %v946_v36 = vmax.f32 %v902_v19, 0.0  ;;  %v879_v52 = vpop.f32.mrf.mxu1 }
 0x124   : > { %v865_v63 = vadd.f32 %v1849_v58, %v864_v62  ;;  %v880_v33 = vadd.f32 %v1849_v58, %v879_v52 }
 0x125   : > { %990 = vxpose.xlu2.b32.cont [2/12] (short) (narrow) %v946_v36, 8 }
 0x126   : > { %v931_v11 = vmax.f32 %v865_v63, 0.0  ;;  %v937_v23 = vmax.f32 %v880_v33, 0.0 }
 0x128   : > { %959 = vxpose.xlu1.b32.cont [3/16] (narrow) %v931_v11, 8  ;;  %v904_v10 = vpop.f32.mrf.mxu2 }
 0x129   : > { %v905_v24 = vadd.f32 %v1849_v58, %v904_v10 }
 0x12b   : > { %v866_v18 = vpop.f32.mrf.mxu0  ;;  %v947_v41 = vmax.f32 %v905_v24, 0.0  ;;  %v881_v13 = vpop.f32.mrf.mxu1 }
 0x12c   : > { %v867_v40 = vadd.f32 %v1849_v58, %v866_v18  ;;  %v882_v27 = vadd.f32 %v1849_v58, %v881_v13 }
 0x12d   : > { %991 = vxpose.xlu2.b32.cont [3/12] (short) (narrow) %v947_v41, 8 }
 0x12e   : > { %v932_v55 = vmax.f32 %v867_v40, 0.0  ;;  %v938_v5 = vmax.f32 %v882_v27, 0.0 }
 0x130   : > { %960 = vxpose.xlu1.b32.cont [4/16] (narrow) %v932_v55, 8  ;;  %v906_v28 = vpop.f32.mrf.mxu2 }
 0x131   : > { %v907_v31 = vadd.f32 %v1849_v58, %v906_v28 }
 0x133   : > { %v869_v39 = vpop.f32.mrf.mxu0  ;;  %v948_v32 = vmax.f32 %v907_v31, 0.0  ;;  %v884_v30 = vpop.f32.mrf.mxu1 }
 0x134   : > { %v870_v21 = vadd.f32 %v1849_v58, %v869_v39  ;;  %v885_v29 = vadd.f32 %v1849_v58, %v884_v30 }
 0x135   : > { %992 = vxpose.xlu2.b32.cont [4/12] (short) (narrow) %v948_v32, 8 }
 0x136   : > { %v933_v14 = vmax.f32 %v870_v21, 0.0  ;;  %v939_v22 = vmax.f32 %v885_v29, 0.0 }
 0x138   : > { %961 = vxpose.xlu1.b32.cont [5/16] (narrow) %v933_v14, 8  ;;  %v909_v42 = vpop.f32.mrf.mxu2 }
 0x139   : > { %v910_v20 = vadd.f32 %v1849_v58, %v909_v42 }
 0x13b   : > { %v871_v45 = vpop.f32.mrf.mxu0  ;;  %v949_v49 = vmax.f32 %v910_v20, 0.0  ;;  %v886_v6 = vpop.f32.mrf.mxu1 }
 0x13c   : > { %v872_v46 = vadd.f32 %v1849_v58, %v871_v45  ;;  %v887_v43 = vadd.f32 %v1849_v58, %v886_v6 }
 0x13d   : > { %993 = vxpose.xlu2.b32.cont [5/12] (short) (narrow) %v949_v49, 8 }
 0x13e   : > { %v934_v50 = vmax.f32 %v872_v46, 0.0  ;;  %v940_v0 = vmax.f32 %v887_v43, 0.0 }
 0x140   : > { %962 = vxpose.xlu1.b32.cont [6/16] (narrow) %v934_v50, 8  ;;  %v911_v26 = vpop.f32.mrf.mxu2  ;;  %v919_v38 = vpop.f32.mrf.mxu3 }
 0x141   : > { %v912_v12 = vadd.f32 %v1849_v58, %v911_v26  ;;  %v920_v1 = vadd.f32 %v1849_v58, %v919_v38 }
 0x143   : > { %v874_v25 = vpop.f32.mrf.mxu0  ;;  %v950_v53 = vmax.f32 %v912_v12, 0.0  ;;  %v953_v35 = vmax.f32 %v920_v1, 0.0 }
 0x144   : > { %v875_v51 = vadd.f32 %v1849_v58, %v874_v25  ;;  %v889_v4 = vpop.f32.mrf.mxu1 }
 0x145   : > { %994 = vxpose.xlu2.b32.cont [6/12] (short) (narrow) %v950_v53, 8  ;;  %v890_v37 = vadd.f32 %v1849_v58, %v889_v4 }
 0x146   : > { %v935_v54 = vmax.f32 %v875_v51, 0.0 }
 0x147   : > { %v941_v36 = vmax.f32 %v890_v37, 0.0 }
 0x148   : > { %963 = vxpose.xlu1.b32.cont [7/16] (narrow) %v935_v54, 8  ;;  %v921_v48 = vpop.f32.mrf.mxu3 }
 0x149   : > { %v914_v2 = vpop.f32.mrf.mxu2  ;;  %v922_v47 = vadd.f32 %v1849_v58, %v921_v48 }
 0x14a   : > { %v915_v8 = vadd.f32 %v1849_v58, %v914_v2 }
 0x14b   : > { %v876_v9 = vpop.f32.mrf.mxu0  ;;  %v954_v44 = vmax.f32 %v922_v47, 0.0 }
 0x14c   : > { %v877_v34 = vadd.f32 %v1849_v58, %v876_v9  ;;  %v951_v56 = vmax.f32 %v915_v8, 0.0  ;;  %v891_v19 = vpop.f32.mrf.mxu1 }
 0x14d   : > { %v892_v63 = vadd.f32 %v1849_v58, %v891_v19 }
 0x14e   : > { %v936_v17 = vmax.f32 %v877_v34, 0.0  ;;  %995 = vxpose.xlu2.b32.cont [7/12] (short) (narrow) %v951_v56, 8 }
 0x14f   : > { %v942_v10 = vmax.f32 %v892_v63, 0.0 }
 0x150   : > { %964 = vxpose.xlu1.b32.cont [8/16] (narrow) %v936_v17, 8 }
 0x151   : > { %v916_v16 = vpop.f32.mrf.mxu2 }
 0x152   : > { %v917_v7 = vadd.f32 %v1849_v58, %v916_v16  ;;  %v924_v57 = vpop.f32.mrf.mxu3 }
 0x153   : > { %v925_v59 = vadd.f32 %v1849_v58, %v924_v57 }
 0x154   : > { %v952_v15 = vmax.f32 %v917_v7, 0.0  ;;  %v894_v11 = vpop.f32.mrf.mxu1 }
 0x155   : > { %v955_v60 = vmax.f32 %v925_v59, 0.0  ;;  %v895_v24 = vadd.f32 %v1849_v58, %v894_v11 }
 0x156   : > { %996 = vxpose.xlu2.b32.cont [8/12] (short) (narrow) %v952_v15, 8 }
 0x157   : > { %v943_v18 = vmax.f32 %v895_v24, 0.0 }
 0x158   : > { %965 = vxpose.xlu1.b32.cont [9/16] (narrow) %v937_v23, 8 }
 0x15a   : > { %v926_v3 = vpop.f32.mrf.mxu3 }
 0x15b   : > { %v927_v61 = vadd.f32 %v1849_v58, %v926_v3 }
 0x15c   : > { %v896_v40 = vpop.f32.mrf.mxu1 }
 0x15d   : > { %v956_v62 = vmax.f32 %v927_v61, 0.0  ;;  %v897_v41 = vadd.f32 %v1849_v58, %v896_v40 }
 0x15e   : > { %997 = vxpose.xlu2.b32.cont [9/12] (short) (narrow) %v953_v35, 8 }
 0x15f   : > { %v944_v55 = vmax.f32 %v897_v41, 0.0 }
 0x160   : > { %966 = vxpose.xlu1.b32.cont [10/16] (narrow) %v938_v5, 8 }
 0x166   : > { %998 = vxpose.xlu2.b32.cont [10/12] (short) (narrow) %v954_v44, 8 }
 0x168   : > { %967 = vxpose.xlu1.b32.cont [11/16] (narrow) %v939_v22, 8 }
 0x16e   : > { %999 = vxpose.xlu2.b32.cont [11/12] (short) (narrow) %v955_v60, 8 }
 0x170   : > { %968 = vxpose.xlu1.b32.cont [12/16] (narrow) %v940_v0, 8 }
 0x176   : > { %1000 = vxpose.xlu2.b32.end [12/12] (short) (narrow) %v956_v62, 8 }
 0x178   : > { %969 = vxpose.xlu1.b32.cont [13/16] (narrow) %v941_v36, 8 }
 0x180   : > { %970 = vxpose.xlu1.b32.cont [14/16] (narrow) %v942_v10, 8 }
 0x188   : > { %971 = vxpose.xlu1.b32.cont [15/16] (narrow) %v943_v18, 8 }
 0x190   : > { %972 = vxpose.xlu1.b32.end [16/16] (narrow) %v944_v55, 8 }
 0x1b7   : > { %v1005_v28 = vpop.trf.xlu2 }
 0x1b8   : > { %v1023_v31 = vrot.slane %v1005_v28, 4 }
 0x1bc   : > { %v973_v39 = vpop.trf.xlu1 }
 0x1bd   : > { %v1025_v21 = vsel %vm1024_vm4, %v973_v39, %v1023_v31 }
 0x1be   : > { %1029 = vst.msk [vmem:[%s170_s29] sm:$0xff] %vm1028_vm6, %v1025_v21 }
 0x1bf PF: > { %s13_s12 = sadd.s32 1, %s1538_s12  }
 0x1c0   : > { %p10_p4 = scmp.ge.s32.totalorder %s13_s12, 4  }
 0x1c2   :  { %12 = sbr.rel (!%p10_p4) target bundleno = 1 (0x1), region = 124 }

</bundles_post_ra>
